<compile_context>
chip_gen: v5e
topology: v5e:2x2
jax: 0.10.0
libtpu: 0.0.40
codegen_flags: <defaults>
</compile_context>

<pallas_src>
import jax
import jax.numpy as jnp
from jax import lax
from jax.experimental import pallas as pl
from jax.experimental.pallas import tpu as pltpu

MAXVAR = -2.0
MINVAR = -3.0


# ----------------------------------------------------------------------------
# Fused kernel: radial weight sample + matmul + Gaussian-KL accumulation.
#
#   W_tile  = mu + exp(0.5 * logsigmasq) * noise      (noise = r * eps/||eps||)
#   acc    += x_tile @ W_tile.T                        (NT dot_general, no transpose)
#   kl_acc += 0.5 * (prlog - plog + (sigma^2 + (mu - prmu)^2) * exp(-prlog) - 1)
#
# Grid: (OUT // tn  [parallel],  IN // tk  [arbitrary / reduction]).
# Each weight tile is visited exactly once, so KL can be accumulated here.
# KL is written as per-row-block partials (OUT, 1) so the parallel axis never
# shares an accumulator across cores (v7x megacore-safe).
# ----------------------------------------------------------------------------
def bayes_linear_kl_kernel(prior_ref, x_ref, mu_ref, logsig_ref, noise_ref,
                           o_ref, kl_ref, acc_ref, kl_acc_ref):
    k = pl.program_id(1)
    nk = pl.num_programs(1)

    @pl.when(k == 0)
    def _():
        acc_ref[...] = jnp.zeros_like(acc_ref)
        kl_acc_ref[...] = jnp.zeros_like(kl_acc_ref)

    mu = mu_ref[...]                               # (tn, tk)
    plog = logsig_ref[...]                         # (tn, tk)
    sigma = jnp.exp(0.5 * plog)                    # needed for the weight sample anyway

    # Radial posterior weight sample for this tile.
    w = mu + sigma * noise_ref[...]                # (tn, tk)

    # x @ W.T without materializing a transpose: contract last dims of both.
    acc_ref[...] += lax.dot_general(
        x_ref[...], w,
        dimension_numbers=(((1,), (1,)), ((), ())),
        preferred_element_type=jnp.float32)        # (B, tn)

    # Fused closed-form Gaussian KL term for this tile (priors are SMEM scalars).
    prior_mu = prior_ref[0]
    prior_logsigmasq = prior_ref[1]
    inv_prior_var = jnp.exp(-prior_logsigmasq)
    diff = mu - prior_mu
    term = 0.5 * (prior_logsigmasq - plog
                  + (sigma * sigma + diff * diff) * inv_prior_var
                  - 1.0)
    # Element-wise accumulate (VPU only); the cross-lane reduce happens once per j.
    kl_acc_ref[...] += term

    @pl.when(k == nk - 1)
    def _():
        o_ref[...] = acc_ref[...].astype(o_ref.dtype)
        kl_ref[...] = jnp.sum(kl_acc_ref[...], axis=1, keepdims=True)   # (tn, 1)


def bayes_linear_kl(x, post_mu, post_logsigmasq, noise, prior_scalars,
                    *, tn=256, tk=512):
    """Returns (output [B, OUT], kl_row_partials [OUT, 1])."""
    B, IN = x.shape
    OUT, IN2 = post_mu.shape
    assert IN == IN2
    tn = min(tn, OUT)
    tk = min(tk, IN)
    assert OUT % tn == 0 and IN % tk == 0, "OUT/IN must be divisible by the tiles"
    # TODO(synk): for batch >> 8 add a 'parallel' batch grid axis (tm=128/256);
    # at small batch the kernel is HBM-bound and B is kept whole.

    grid = (OUT // tn, IN // tk)
    out, kl_rows = pl.pallas_call(
        bayes_linear_kl_kernel,
        out_shape=(
            jax.ShapeDtypeStruct((B, OUT), x.dtype),
            jax.ShapeDtypeStruct((OUT, 1), jnp.float32),
        ),
        grid_spec=pltpu.PrefetchScalarGridSpec(
            num_scalar_prefetch=0,
            grid=grid,
            in_specs=[
                pl.BlockSpec(memory_space=pltpu.MemorySpace.SMEM),   # priors (2,)
                pl.BlockSpec((B, tk), lambda j, k: (0, k)),          # x
                pl.BlockSpec((tn, tk), lambda j, k: (j, k)),         # post_mu
                pl.BlockSpec((tn, tk), lambda j, k: (j, k)),         # post_logsigmasq
                pl.BlockSpec((tn, tk), lambda j, k: (j, k)),         # radial noise
            ],
            out_specs=[
                pl.BlockSpec((B, tn), lambda j, k: (0, j)),          # output
                pl.BlockSpec((tn, 1), lambda j, k: (j, 0)),          # KL row partials
            ],
            scratch_shapes=[
                pltpu.VMEM((B, tn), jnp.float32),    # matmul accumulator
                pltpu.VMEM((tn, tk), jnp.float32),   # KL element-wise accumulator
            ],
        ),
        compiler_params=pltpu.CompilerParams(
            dimension_semantics=("parallel", "arbitrary")),
    )(prior_scalars, x, post_mu, post_logsigmasq, noise)
    return out, kl_rows


# ----------------------------------------------------------------------------
# Module wrapper: parameter init (deterministic) + forward = (output, kl)
# ----------------------------------------------------------------------------
def init_linear_params(key, in_features, out_features):
    k_mu, k_ls = jax.random.split(key)
    stdv = 0.5
    post_mu = jax.random.uniform(
        k_mu, (out_features, in_features), jnp.float32, -stdv, stdv)
    post_logsigmasq = jax.random.uniform(
        k_ls, (out_features, in_features), jnp.float32, MINVAR, MAXVAR)
    return post_mu, post_logsigmasq


def linear_forward(x, params, noise_key, *, prior_mu=0.0, prior_logsigmasq=0.0,
                   tn=256, tk=512):
    post_mu, post_logsigmasq = params
    # Radial posterior noise (plain-JAX glue: needs RNG + a global Frobenius norm).
    k_eps, k_r = jax.random.split(noise_key)
    eps = jax.random.normal(k_eps, post_mu.shape, jnp.float32)
    r = jax.random.normal(k_r, (), jnp.float32)
    noise = r * eps / jnp.linalg.norm(eps)

    prior_scalars = jnp.array([prior_mu, prior_logsigmasq], jnp.float32)
    output, kl_rows = bayes_linear_kl(
        x, post_mu, post_logsigmasq, noise, prior_scalars, tn=tn, tk=tk)
    return output, jnp.sum(kl_rows)


if __name__ == "__main__":
    key = jax.random.PRNGKey(0)
    k_param, k_x, k_noise = jax.random.split(key, 3)

    B, IN, OUT = 8, 256, 256
    params = init_linear_params(k_param, IN, OUT)
    x = jax.random.normal(k_x, (B, IN), jnp.float32)

    # Small tiles here so the demo exercises a non-trivial (2, 2) grid.
    output, kl = linear_forward(x, params, k_noise, tn=128, tk=128)
    output = jax.block_until_ready(output)
    kl = jax.block_until_ready(kl)

    # Sanity check against a plain-JAX reference of the same math.
    post_mu, post_logsigmasq = params
    k_eps, k_r = jax.random.split(k_noise)
    eps = jax.random.normal(k_eps, post_mu.shape, jnp.float32)
    r = jax.random.normal(k_r, (), jnp.float32)
    w_ref = post_mu + jnp.exp(0.5 * post_logsigmasq) * (r * eps / jnp.linalg.norm(eps))
    out_ref = x @ w_ref.T
    kl_ref = 0.5 * jnp.sum(
        0.0 - post_logsigmasq
        + (jnp.exp(post_logsigmasq) + (post_mu - 0.0) ** 2) / jnp.exp(0.0) - 1.0)

    assert jnp.allclose(output, out_ref, atol=1e-3, rtol=1e-4), (
        float(jnp.max(jnp.abs(output - out_ref))))
    assert jnp.allclose(kl, kl_ref, atol=1e-2, rtol=1e-4), (float(kl), float(kl_ref))

    print("KERNEL_OK")
</pallas_src>

<mosaic_0001>
module attributes {stable_mosaic.version = 11 : i64} {
  func.func @bayes_linear_kl_kernel(%arg0: i32, %arg1: i32, %arg2: memref<2xf32, #tpu.memory_space<smem>>, %arg3: memref<8x128xf32, #tpu.memory_space<vmem>>, %arg4: memref<128x128xf32, #tpu.memory_space<vmem>>, %arg5: memref<128x128xf32, #tpu.memory_space<vmem>>, %arg6: memref<128x128xf32, #tpu.memory_space<vmem>>, %arg7: memref<8x128xf32, #tpu.memory_space<vmem>>, %arg8: memref<128x1xf32, #tpu.memory_space<vmem>>, %arg9: memref<8x128xf32, #tpu.memory_space<vmem>>, %arg10: memref<128x128xf32, #tpu.memory_space<vmem>>) attributes {dimension_semantics = [#tpu.dimension_semantics<parallel>, #tpu.dimension_semantics<arbitrary>], iteration_bounds = array<i64: 2, 2>, scalar_prefetch = 0 : i64, scratch_operands = 2 : i64, tpu.core_type = #tpu.core_type<tc>, window_params = [{transform_indices = @transform_0, window_bounds = array<i64: 2>}, {transform_indices = @transform_1, window_bounds = array<i64: 8, 128>}, {transform_indices = @transform_2, window_bounds = array<i64: 128, 128>}, {transform_indices = @transform_3, window_bounds = array<i64: 128, 128>}, {transform_indices = @transform_4, window_bounds = array<i64: 128, 128>}, {transform_indices = @transform_5, window_bounds = array<i64: 8, 128>}, {transform_indices = @transform_6, window_bounds = array<i64: 128, 1>}]} {
    %c0_i32 = arith.constant 0 : i32
    %0 = arith.cmpi eq, %arg1, %c0_i32 : i32
    %1 = arith.extui %0 : i1 to i32
    %c0_i32_0 = arith.constant 0 : i32
    %2 = arith.cmpi ne, %1, %c0_i32_0 : i32
    scf.if %2 {
      %cst_22 = arith.constant 0.000000e+00 : f32
      %40 = vector.broadcast %cst_22 : f32 to vector<8x128xf32>
      %c0_23 = arith.constant 0 : index
      %c0_24 = arith.constant 0 : index
      %41 = vector.load %arg9[%c0_23, %c0_24] : memref<8x128xf32, #tpu.memory_space<vmem>>, vector<8x128xf32>
      tpu.vector_store %arg9[%c0_23, %c0_24], %40 {strides = array<i32>} : memref<8x128xf32, #tpu.memory_space<vmem>>, vector<8x128xf32>,
      %cst_25 = arith.constant 0.000000e+00 : f32
      %42 = vector.broadcast %cst_25 : f32 to vector<128x128xf32>
      %c0_26 = arith.constant 0 : index
      %c0_27 = arith.constant 0 : index
      %43 = vector.load %arg10[%c0_26, %c0_27] : memref<128x128xf32, #tpu.memory_space<vmem>>, vector<128x128xf32>
      tpu.vector_store %arg10[%c0_26, %c0_27], %42 {strides = array<i32>} : memref<128x128xf32, #tpu.memory_space<vmem>>, vector<128x128xf32>,
    } else {
    }
    %c0 = arith.constant 0 : index
    %c0_1 = arith.constant 0 : index
    %3 = vector.load %arg4[%c0, %c0_1] : memref<128x128xf32, #tpu.memory_space<vmem>>, vector<128x128xf32>
    %c0_2 = arith.constant 0 : index
    %c0_3 = arith.constant 0 : index
    %4 = vector.load %arg5[%c0_2, %c0_3] : memref<128x128xf32, #tpu.memory_space<vmem>>, vector<128x128xf32>
    %cst = arith.constant 5.000000e-01 : f32
    %5 = vector.broadcast %cst : f32 to vector<128x128xf32>
    %6 = arith.mulf %5, %4 : vector<128x128xf32>
    %7 = math.exp %6 : vector<128x128xf32>
    %c0_4 = arith.constant 0 : index
    %c0_5 = arith.constant 0 : index
    %8 = vector.load %arg6[%c0_4, %c0_5] : memref<128x128xf32, #tpu.memory_space<vmem>>, vector<128x128xf32>
    %9 = arith.mulf %7, %8 : vector<128x128xf32>
    %10 = arith.addf %3, %9 : vector<128x128xf32>
    %c0_6 = arith.constant 0 : index
    %c0_7 = arith.constant 0 : index
    %11 = vector.load %arg9[%c0_6, %c0_7] : memref<8x128xf32, #tpu.memory_space<vmem>>, vector<8x128xf32>
    %c0_8 = arith.constant 0 : index
    %c0_9 = arith.constant 0 : index
    %12 = vector.load %arg3[%c0_8, %c0_9] : memref<8x128xf32, #tpu.memory_space<vmem>>, vector<8x128xf32>
    %cst_10 = arith.constant dense<0.000000e+00> : vector<8x128xf32>
    %13 = tpu.matmul %12, %10, %cst_10 {dimension_numbers = #tpu.dot_dimension_numbers<[1], [1], [0], [0], [0, 0, 1, 0], [], []>} : vector<8x128xf32>, vector<128x128xf32>, vector<8x128xf32> -> vector<8x128xf32>
    %14 = arith.addf %11, %13 : vector<8x128xf32>
    %c0_11 = arith.constant 0 : index
    %c0_12 = arith.constant 0 : index
    %15 = vector.load %arg9[%c0_11, %c0_12] : memref<8x128xf32, #tpu.memory_space<vmem>>, vector<8x128xf32>
    tpu.vector_store %arg9[%c0_11, %c0_12], %14 {strides = array<i32>} : memref<8x128xf32, #tpu.memory_space<vmem>>, vector<8x128xf32>,
    %c0_13 = arith.constant 0 : index
    %16 = memref.load %arg2[%c0_13] : memref<2xf32, #tpu.memory_space<smem>>
    %c1 = arith.constant 1 : index
    %17 = memref.load %arg2[%c1] : memref<2xf32, #tpu.memory_space<smem>>
    %cst_14 = arith.constant 0.000000e+00 : f32
    %18 = arith.subf %cst_14, %17 : f32
    %19 = math.exp %18 : f32
    %20 = vector.broadcast %16 : f32 to vector<128x128xf32>
    %21 = arith.subf %3, %20 : vector<128x128xf32>
    %22 = vector.broadcast %17 : f32 to vector<128x128xf32>
    %23 = arith.subf %22, %4 : vector<128x128xf32>
    %24 = arith.mulf %7, %7 : vector<128x128xf32>
    %25 = arith.mulf %21, %21 : vector<128x128xf32>
    %26 = arith.addf %24, %25 : vector<128x128xf32>
    %27 = vector.broadcast %19 : f32 to vector<128x128xf32>
    %28 = arith.mulf %26, %27 : vector<128x128xf32>
    %29 = arith.addf %23, %28 : vector<128x128xf32>
    %cst_15 = arith.constant 1.000000e+00 : f32
    %30 = vector.broadcast %cst_15 : f32 to vector<128x128xf32>
    %31 = arith.subf %29, %30 : vector<128x128xf32>
    %cst_16 = arith.constant 5.000000e-01 : f32
    %32 = vector.broadcast %cst_16 : f32 to vector<128x128xf32>
    %33 = arith.mulf %32, %31 : vector<128x128xf32>
    %c0_17 = arith.constant 0 : index
    %c0_18 = arith.constant 0 : index
    %34 = vector.load %arg10[%c0_17, %c0_18] : memref<128x128xf32, #tpu.memory_space<vmem>>, vector<128x128xf32>
    %35 = arith.addf %34, %33 : vector<128x128xf32>
    %c0_19 = arith.constant 0 : index
    %c0_20 = arith.constant 0 : index
    %36 = vector.load %arg10[%c0_19, %c0_20] : memref<128x128xf32, #tpu.memory_space<vmem>>, vector<128x128xf32>
    tpu.vector_store %arg10[%c0_19, %c0_20], %35 {strides = array<i32>} : memref<128x128xf32, #tpu.memory_space<vmem>>, vector<128x128xf32>,
    %c1_i32 = arith.constant 1 : i32
    %37 = arith.cmpi eq, %arg1, %c1_i32 : i32
    %38 = arith.extui %37 : i1 to i32
    %c0_i32_21 = arith.constant 0 : i32
    %39 = arith.cmpi ne, %38, %c0_i32_21 : i32
    scf.if %39 {
      %c0_22 = arith.constant 0 : index
      %c0_23 = arith.constant 0 : index
      %40 = vector.load %arg9[%c0_22, %c0_23] : memref<8x128xf32, #tpu.memory_space<vmem>>, vector<8x128xf32>
      %c0_24 = arith.constant 0 : index
      %c0_25 = arith.constant 0 : index
      %41 = vector.load %arg7[%c0_24, %c0_25] : memref<8x128xf32, #tpu.memory_space<vmem>>, vector<8x128xf32>
      tpu.vector_store %arg7[%c0_24, %c0_25], %40 {strides = array<i32>} : memref<8x128xf32, #tpu.memory_space<vmem>>, vector<8x128xf32>,
      %c0_26 = arith.constant 0 : index
      %c0_27 = arith.constant 0 : index
      %42 = vector.load %arg10[%c0_26, %c0_27] : memref<128x128xf32, #tpu.memory_space<vmem>>, vector<128x128xf32>
      %cst_28 = arith.constant dense<0.000000e+00> : vector<128xf32>
      %43 = vector.multi_reduction <add>, %42, %cst_28 [1] : vector<128x128xf32> to vector<128xf32>
      %44 = vector.shape_cast %43 : vector<128xf32> to vector<128x1xf32>
      %c0_29 = arith.constant 0 : index
      %c0_30 = arith.constant 0 : index
      %45 = vector.load %arg8[%c0_29, %c0_30] : memref<128x1xf32, #tpu.memory_space<vmem>>, vector<128x1xf32>
      tpu.vector_store %arg8[%c0_29, %c0_30], %44 {strides = array<i32>} : memref<128x1xf32, #tpu.memory_space<vmem>>, vector<128x1xf32>,
    } else {
    }
    return
  }
  func.func @transform_0(%arg0: i32, %arg1: i32) -> i32 {
    %c0_i32 = arith.constant 0 : i32
    %c0_i32_0 = arith.constant 0 : i32
    return %c0_i32 : i32
  }
  func.func @transform_1(%arg0: i32, %arg1: i32) -> (i32, i32) {
    %c0_i32 = arith.constant 0 : i32
    %c0_i32_0 = arith.constant 0 : i32
    return %c0_i32, %arg1 : i32, i32
  }
  func.func @transform_2(%arg0: i32, %arg1: i32) -> (i32, i32) {
    %c0_i32 = arith.constant 0 : i32
    return %arg0, %arg1 : i32, i32
  }
  func.func @transform_3(%arg0: i32, %arg1: i32) -> (i32, i32) {
    %c0_i32 = arith.constant 0 : i32
    return %arg0, %arg1 : i32, i32
  }
  func.func @transform_4(%arg0: i32, %arg1: i32) -> (i32, i32) {
    %c0_i32 = arith.constant 0 : i32
    return %arg0, %arg1 : i32, i32
  }
  func.func @transform_5(%arg0: i32, %arg1: i32) -> (i32, i32) {
    %c0_i32 = arith.constant 0 : i32
    %c0_i32_0 = arith.constant 0 : i32
    return %c0_i32, %arg0 : i32, i32
  }
  func.func @transform_6(%arg0: i32, %arg1: i32) -> (i32, i32) {
    %c0_i32 = arith.constant 0 : i32
    %c0_i32_0 = arith.constant 0 : i32
    return %arg0, %c0_i32 : i32, i32
  }
}

</mosaic_0001>

<bundles_post_ra>
// kernel: tpu_custom_call.1
= control target key start
LH: loop header
LB: loop body
LE: loop exit
PB: predicated region body
PF: predicated region fallthrough
CT: control target
= control target key end

     0   :  { %s2290_s0 = inlined_call_operand.hbm [shape: f32[2], index: 0, kind: input, shape index: {}]   ;;  %s2291_s1 = inlined_call_operand.hbm [shape: f32[8,256], index: 1, kind: input, shape index: {}]   ;;  %s2292_s2 = inlined_call_operand.hbm [shape: f32[256,256], index: 2, kind: input, shape index: {}]   ;;  %s2293_s3 = inlined_call_operand.hbm [shape: f32[256,256], index: 3, kind: input, shape index: {}]   ;;  %s2294_s4 = inlined_call_operand.hbm [shape: f32[256,256], index: 4, kind: input, shape index: {}]   ;;  %s2295_s5 = inlined_call_operand.hbm [shape: f32[8,256], index: 5, kind: output, shape index: {0}]   ;;  %s2296_s6 = inlined_call_operand.vmem [shape: f32[256,1], index: 6, kind: output, shape index: {1}]  }
   0x1   :  { %2322 = sst [smem:[#allocation34_spill]] %s2290_s0 }
   0x2   :  { %2323 = sst [smem:[#allocation35_spill]] %s2291_s1 }
   0x3   :  { %2324 = sst [smem:[#allocation36_spill]] %s2292_s2 }
   0x4   :  { %2325 = sst [smem:[#allocation37_spill]] %s2293_s3 }
   0x5   :  { %2326 = sst [smem:[#allocation38_spill]] %s2295_s5 }
   0x6   :  { %2327 = sst [smem:[#allocation39_spill]] %s2296_s6 }
   0x7   :  { %12 = vsyncpa [#allocation7], 0 }
   0x8   :  { %13 = vsyncpa [#allocation5], 0 }
   0x9   :  { %15 = vsyncpa [#allocation5 + $0x1], 0 }
   0xa   :  { %16 = vsyncpa [#allocation10], 0 }
   0xb   :  { %18 = vsyncpa [#allocation10 + $0x1], 0 }
   0xc   :  { %19 = vsyncpa [#allocation13], 0 }
   0xd   :  { %21 = vsyncpa [#allocation13 + $0x1], 0 }
   0xe   :  { %22 = vsyncpa [#allocation6], 0 }
   0xf   :  { %24 = vsyncpa [#allocation6 + $0x1], 0  ;;  %s1689_s21 = smov 0   ;;  %s1691_s22 = smov 0  }
  0x10   :  { %s1693_s23 = smov 0   ;;  %s1695_s24 = smov 0  }
  0x11   :  { %s1697_s25 = smov 0   ;;  %s1699_s26 = smov 0  }
  0x12   :  { %s1701_s27 = smov 0   ;;  %s1703_s28 = smov 0  }
  0x13   :  { %s1705_s29 = smov 0   ;;  %s1707_s30 = smov 0  }
  0x14   :  { %s1709_s7 = smov 0   ;;  %s1711_s8 = smov 0  }
  0x15   :  { %s1713_s9 = smov 0   ;;  %s1715_s10 = smov 0  }
  0x16 LB: > { %2328 = sst [smem:[#allocation20_spill]] %s1595_s21  ;;  %p78_p0 = scmp.eq.s32.totalorder %s1647_s10, 0  ;;  %s1647_s10 = sphi %s1715_s10, %s30_s10   ;;  %s1643_s9 = sphi %s1713_s9, %s2383_s9   ;;  %s1639_s8 = sphi %s1711_s8, %s2382_s8   ;;  %s1635_s7 = sphi %s1709_s7, %s2391_s7   ;;  %s1631_s30 = sphi %s1707_s30, %s2390_s30   ;;  %s1627_s29 = sphi %s1705_s29, %s2389_s29   ;;  %s1623_s28 = sphi %s1703_s28, %s2388_s28   ;;  %s1619_s27 = sphi %s1701_s27, %s2379_s27   ;;  %s1615_s26 = sphi %s1699_s26, %s2387_s26   ;;  %s1611_s25 = sphi %s1697_s25, %s2386_s25   ;;  %s1607_s24 = sphi %s1695_s24, %s2378_s24   ;;  %s1603_s23 = sphi %s1693_s23, %s2385_s23   ;;  %s1599_s22 = sphi %s1691_s22, %s2384_s22   ;;  %s1595_s21 = sphi %s1689_s21, %s2377_s21  }
  0x17   : > { %2329 = sst [smem:[#allocation21_spill]] %s1599_s22  ;;  %p105_p1 = scmp.ne.s32.totalorder %s1615_s26, %s1611_s25 }
  0x18   : > { %2330 = sst [smem:[#allocation22_spill]] %s1611_s25  ;;  %p2306_p2 = scmp.lt.s32.totalorder %s1647_s10, 4 }
  0x19   : > { %2331 = sst [smem:[#allocation23_spill]] %s1623_s28  ;;  %p107_p3 = por %p105_p1, %p78_p0 }
  0x1a   : > { %2332 = sst [smem:[#allocation24_spill]] %s1631_s30  ;;  %s272_s13 = sand.u32 1, %s1647_s10  }
  0x1b   : > { %2333 = sst [smem:[#allocation25_spill]] %s1635_s7  ;;  %s2297_s14 = sand.u32 1, %s1615_s26  }
  0x1c   : > { %2334 = sst [smem:[#allocation26_spill]] %s1639_s8  ;;  %s1771_s15 = sshll.u32 %s2297_s14, 7 }
  0x1d   : > { %2335 = sst [smem:[#allocation27_spill]] %s1643_s9  ;;  %s1159_s16 = sshll.u32 %s1643_s9, 5 }
  0x1e   : > { %s281_s17 = sadd.s32 %s1639_s8, %s1159_s16  ;;  %s276_s19 = scalar_lea.vmem [#allocation9], %s1771_s15 }
  0x1f   : > { %s1775_s18 = sshll.u32 %s281_s17, 3  ;;  %s286_s20 = sshll.u32 %s276_s19, 4  ;;  %s287_s20 = int_to_ptr.vmem [resolvable:$true] %s286_s20 }
  0x20   : > { %s2336_s2 = sld [smem:[#allocation36_spill]]  ;;  %p1784_p4 = pnand %p2306_p2, %p107_p3 }
  0x21   : > { %s1788_s17 = scalar_lea.sflag [#allocation10], %s272_s13  ;;  %s2299_s19 = smov 256  }
  0x22   : > { %s2301_s11 = smov 128   ;;  %s2303_s12 = smov 8  }
  0x23   : > { %p111_p6 = scmp.ne.s32.totalorder %s1611_s25, %s1607_s24  ;;  %p190_p7 = scmp.ne.s32.totalorder %s1603_s23, %s1599_s22 }
  0x24   : > { %p196_p10 = scmp.ne.s32.totalorder %s1599_s22, %s1595_s21  ;;  %p1110_p13 = scmp.ge.s32.totalorder %s1647_s10, 1 }
  0x25   : > { %p230_p1 = scmp.lt.s32.totalorder %s1647_s10, 5  ;;  %s2345_s0 = sld [smem:[#allocation34_spill]] }
  0x26   : > { %s283_s14 = scalar_lea.hbm %s2336_s2, %s1775_s18  ;;  %s1109_s2 = sadd.s32 4294967294, %s1647_s10  }
  0x27   : > { %s284_s5 = sshll.u32 %s283_s14, 4  ;;  %s1797_s14 = sadd.s32 4294967295, %s1647_s10   ;;  %s285_s5 = int_to_ptr.hbm [resolvable:$true] %s284_s5 }
  0x28   : > { %1188 = dma.hbm_to_vmem [thread:$0]  (!%p1784_p4), %s285_s5, 2048, %s287_s20, %s1788_s17, %s2299_s19, %s2301_s11, %s2303_s12  }
  0x29   : > { %p84_p5 = scmp.eq.s32.totalorder %s1797_s14, 0  ;;  %p191_p8 = scmp.eq.s32.totalorder %s1797_s14, 3 }
  0x2a   : > { %p197_p12 = scmp.eq.s32.totalorder %s1109_s2, 3  ;;  %s39_s2 = sadd.s32 1, %s1639_s8 }
  0x2b   : > { %p1809_p9 = por %p111_p6, %p84_p5  ;;  %p1815_p11 = por %p191_p8, %p190_p7 }
  0x2c   : > { %p1821_p3 = por %p197_p12, %p196_p10  ;;  %p1825_p6 = pnand %p1110_p13, %p230_p1 }
  0x2d   : > { %s2338_s30 = scalar_select %p1809_p9, 1, 0 }
  0x2e   : > { %s2340_s5 = scalar_select %p1815_p11, 1, 0 }
  0x2f   : > { %2339 = sst [smem:[#allocation28_spill]] %s2338_s30  ;;  %s242_s12 = sshll.u32 %s2345_s0, 4  ;;  %s243_s12 = int_to_ptr.hbm [resolvable:$true] %s242_s12 }
  0x30   : > { %2341 = sst [smem:[#allocation29_spill]] %s2340_s5  ;;  %p1178_p7 = pneg %p1825_p6 }
  0x31   : > { %s2342_s24 = scalar_select %p1821_p3, 1, 0 }
  0x32   : > { %p1179_p8 = pnand %p1178_p7, %p84_p5  ;;  %s1652_s13 = smov [#allocation4]  }
  0x33   : > { %2343 = sst [smem:[#allocation30_spill]] %s2342_s24  ;;  %p40_p10 = scmp.ge.s32.totalorder %s39_s2, 2 }
  0x34   : > { %1181 = dma.hbm_to_smem (!%p1179_p8), %s243_s12, 16, %s1652_s13, [#allocation7]  }
  0x35   : > { %s70_s24 = sadd.s32 1, %s1627_s29  ;;  %p77_p12 = scmp.ne.s32.totalorder %s1627_s29, %s1623_s28 }
  0x36   : > { %p83_p13 = scmp.ne.s32.totalorder %s1623_s28, %s1619_s27  ;;  %s2393_s2 = smov (%p40_p10, %s39_s2), 0 }
  0x37   : > { %2346 = sst [smem:[#allocation31_spill]] %s2393_s2  ;;  %s2347_s19 = sadd.s32 1, %s1643_s9 }
  0x38   : > { %s2395_s19 = smov (!%p40_p10, %s2347_s19), %s1643_s9  ;;  %s67_s11 = ssub.s32 %s1639_s8, %s2393_s2 }
  0x39   : > { %p1851_p1 = por %p78_p0, %p77_p12  ;;  %p44_p7 = scmp.ge.s32.totalorder %s2395_s19, 2 }
  0x3a   : > { %p68_p8 = scmp.eq.s32.totalorder %s67_s11, 0  ;;  %p1857_p2 = por %p84_p5, %p83_p13 }
  0x3b   : > { %s253_s12 = sand.u32 1, %s1627_s29   ;;  %s2397_s19 = smov (%p44_p7, %s2395_s19), 0 }
  0x3c   : > { %s2349_s27 = scalar_select %p1857_p2, 1, 0 }
  0x3d   : > { %2351 = sst [smem:[#allocation33_spill]] %s2397_s19  ;;  %s93_s2 = ssub.s32 %s1643_s9, %s2397_s19 }
  0x3e   : > { %2350 = sst [smem:[#allocation32_spill]] %s2349_s27  ;;  %s95_s21 = sor.u32 %s93_s2, %s67_s11 }
  0x3f   : > { %s1865_s13 = scalar_select %p68_p8, %s1627_s29, %s70_s24  }
  0x40   : > { %p178_p0 = scmp.eq.s32.totalorder %s93_s2, 0  ;;  %p96_p10 = scmp.eq.s32.totalorder %s95_s21, 0 }
  0x41   : > { %s1113_s5 = sshll.u32 %s253_s12, 3  ;;  %s2352_s6 = sadd.s32 1, %s1603_s23 }
  0x42   : > { %s1872_s7 = scalar_select %p178_p0, %s1603_s23, %s2352_s6  }
  0x43   : > { %s2353_s22 = sadd.s32 1, %s1615_s26  ;;  %s1114_s25 = sshll.u32 %s1639_s8, 3 }
  0x44   : > { %s1877_s30 = scalar_select %p96_p10, %s1615_s26, %s2353_s22  }
  0x45   : > { %s2354_s1 = sld [smem:[#allocation35_spill]]  ;;  %s257_s19 = scalar_lea.vmem [#allocation8], %s1113_s5 }
  0x46   : > { %s265_s11 = sshll.u32 %s257_s19, 4  ;;  %p2355_p12 = scmp.lt.s32.totalorder %s1647_s10, 4  ;;  %s266_s11 = int_to_ptr.vmem [resolvable:$true] %s265_s11 }
  0x47   : > { %s2356_s3 = sld [smem:[#allocation37_spill]]  ;;  %s254_s27 = scalar_lea.sflag [#allocation5], %s253_s12 }
  0x48   : > { %p1183_p13 = pnand %p2355_p12, %p1851_p1  ;;  %s2357_s19 = smov 8  }
  0x49   : > { %s331_s8 = scalar_lea.hbm %s2294_s4, %s1775_s18  ;;  %s324_s22 = scalar_lea.vmem [#allocation12], %s1771_s15 }
  0x4a   : > { %s332_s6 = sshll.u32 %s331_s8, 4  ;;  %s2360_s12 = sand.u32 1, %s1615_s26   ;;  %s333_s6 = int_to_ptr.hbm [resolvable:$true] %s332_s6 }
  0x4b   : > { %s261_s24 = scalar_lea.hbm %s2354_s1, %s1114_s25  ;;  %s300_s25 = scalar_lea.vmem [#allocation11], %s1771_s15 }
  0x4c   : > { %s263_s21 = sshll.u32 %s261_s24, 4  ;;  %s310_s5 = sshll.u32 %s300_s25, 4  ;;  %s264_s21 = int_to_ptr.hbm [resolvable:$true] %s263_s21  ;;  %s311_s5 = int_to_ptr.vmem [resolvable:$true] %s310_s5 }
  0x4d   : > { %s307_s2 = scalar_lea.hbm %s2356_s3, %s1775_s18  ;;  %s2358_s24 = smov 128  }
  0x4e   : > { %s308_s28 = sshll.u32 %s307_s2, 4  ;;  %s2359_s1 = smov 256   ;;  %s309_s28 = int_to_ptr.hbm [resolvable:$true] %s308_s28 }
  0x4f   : > { %1185 = dma.hbm_to_vmem [thread:$0]  (!%p1183_p13), %s264_s21, 128, %s266_s11, %s254_s27  }
  0x50   : > { %1191 = dma.hbm_to_vmem [thread:$0]  (!%p1784_p4), %s309_s28, 2048, %s311_s5, %s1788_s17, %s2359_s1, %s2358_s24, %s2357_s19  }
  0x51   : > { %s334_s3 = sshll.u32 %s324_s22, 4  ;;  %s321_s11 = scalar_lea.sflag [#allocation13], %s2360_s12  ;;  %s335_s3 = int_to_ptr.vmem [resolvable:$true] %s334_s3 }
  0x52   : > { %1194 = dma.hbm_to_vmem [thread:$0]  (!%p1784_p4), %s333_s6, 2048, %s335_s3, %s321_s11, %s2359_s1, %s2358_s24, %s2357_s19  }
  0x53   : > { %346 = sbr.rel (%p1825_p6) target bundleno = 535 (0x217), region = 40 }
  0x58   : > { %1574 = dma.done.wait (%p84_p5), [#allocation7], 16  }
  0x59   : > { %1576 = vsyncadd (%p84_p5), [#allocation7], 4294967280  ;;  %s2361_s8 = sld [smem:[#allocation23_spill]] }
  0x5f   : > { %s353_s15 = sand.u32 1, %s2361_s8  }
  0x60   : > { %s1917_s18 = sshll.u32 %s353_s15, 3  ;;  %s354_s16 = scalar_lea.sflag [#allocation5], %s353_s15 }
  0x61   : > { %s357_s17 = scalar_lea.vmem [#allocation8], %s1917_s18 }
  0x62   : > { %1578 = dma.done.wait (%p1857_p2), %s354_s16, 128  }
  0x63   : > { %1580 = vsyncadd (%p1857_p2), %s354_s16, 4294967168  ;;  %s2363_s1 = sld [smem:[#allocation22_spill]]  ;;  %s363_s20 = sand.u32 1, %s1797_s14  }
  0x64   : > { %s364_s28 = scalar_lea.sflag [#allocation10], %s363_s20 }
  0x69   : > { %s365_s21 = sand.u32 1, %s2363_s1  }
  0x6a   : > { %s1130_s2 = sshll.u32 %s365_s21, 7 }
  0x6b   : > { %s1926_s27 = scalar_lea.vmem [#allocation9], %s1130_s2 }
  0x6c   : > { %1582 = dma.done.wait (%p1809_p9), %s364_s28, 4096  }
  0x6d   : > { %1584 = vsyncadd (%p1809_p9), %s364_s28, 4294963200  ;;  %s1932_s25 = scalar_lea.vmem [#allocation11], %s1130_s2  ;;  %s384_s5 = scalar_lea.sflag [#allocation13], %s365_s21 }
  0x6e   : > { %s1934_s19 = scalar_lea.vmem [#allocation12], %s1130_s2 }
  0x6f   : > { %1586 = dma.done.wait (%p1809_p9), %s384_s5, 2048  }
  0x70   : > { %1588 = vsyncadd (%p1809_p9), %s384_s5, 4294965248 }
  0x71   : > { %393 = sfence }
  0x72   : > { %s2365_s14 = sld [smem:[#allocation21_spill]] }
  0x73   : > { %s2366_s24 = sld [smem:[#allocation25_spill]] }
  0x74   : > { %s2367_s9 = sld [smem:[#allocation39_spill]] }
  0x75   : > { %s2368_s1 = sld [smem:[#allocation24_spill]] }
  0x78   : > { %s428_s0 = sand.u32 1, %s2365_s14  }
  0x79   : > { %s1134_s6 = sshll.u32 %s2366_s24, 4  ;;  %s1944_s22 = sshll.u32 %s428_s0, 3 }
  0x7a   : > { %p442_p2 = scmp.lt.s32.totalorder %s1134_s6, 31  ;;  %s430_s16 = scalar_lea.vmem [#allocation14], %s1944_s22 }
  0x7b   : > { %p1136_p4 = scmp.ne.s32.totalorder %s2368_s1, 0 }
  0x7c   : > { %s2399_s6 = smov (!%p442_p2, %s1134_s6), 31 }
  0x7d   : > { %s1135_s12 = sshll.u32 %s2399_s6, 3  ;;  %450 = sbr.rel (%p1136_p4) target bundleno = 148 (0x94), region = 64 }
  0x7e   : > { %s1949_s15 = scalar_lea.vmem %s2367_s9, %s1135_s12 }
  0x82   : > { %v1653_v0 = vmov 0.0  }
  0x83   : > { %451 = vst [vmem:[#allocation2] sm:$0xff] %v1653_v0 }
  0x84   : > { %452 = vst [vmem:[#allocation3 + $0x30] sm:$0xff] %v1653_v0 }
  0x85   : > { %453 = vst [vmem:[#allocation3] sm:$0xff] %v1653_v0 }
  0x86   : > { %454 = vst [vmem:[#allocation3 + $0x58] sm:$0xff] %v1653_v0 }
  0x87   : > { %455 = vst [vmem:[#allocation3 + $0x18] sm:$0xff] %v1653_v0 }
  0x88   : > { %456 = vst [vmem:[#allocation3 + $0x50] sm:$0xff] %v1653_v0 }
  0x89   : > { %457 = vst [vmem:[#allocation3 + $0x68] sm:$0xff] %v1653_v0 }
  0x8a   : > { %458 = vst [vmem:[#allocation3 + $0x8] sm:$0xff] %v1653_v0 }
  0x8b   : > { %459 = vst [vmem:[#allocation3 + $0x48] sm:$0xff] %v1653_v0 }
  0x8c   : > { %460 = vst [vmem:[#allocation3 + $0x40] sm:$0xff] %v1653_v0 }
  0x8d   : > { %461 = vst [vmem:[#allocation3 + $0x20] sm:$0xff] %v1653_v0 }
  0x8e   : > { %462 = vst [vmem:[#allocation3 + $0x10] sm:$0xff] %v1653_v0 }
  0x8f   : > { %463 = vst [vmem:[#allocation3 + $0x38] sm:$0xff] %v1653_v0 }
  0x90   : > { %464 = vst [vmem:[#allocation3 + $0x60] sm:$0xff] %v1653_v0 }
  0x91   : > { %465 = vst [vmem:[#allocation3 + $0x70] sm:$0xff] %v1653_v0 }
  0x92   : > { %466 = vst [vmem:[#allocation3 + $0x78] sm:$0xff] %v1653_v0 }
  0x93   : > { %467 = vst [vmem:[#allocation3 + $0x28] sm:$0xff] %v1653_v0 }
  0x94 PF: > { %v1954_v1 = vld [vmem:[%s1932_s25 + $0x78] sm:$0xff]  ;;  %s620_s3 = sld [smem:[#allocation4]]  ;;  %v1958_v3 = vld [vmem:[%s1932_s25 + $0x70] sm:$0xff]  ;;  %v1962_v5 = vld [vmem:[%s1932_s25 + $0x68] sm:$0xff] }
  0x95   : > { %v515_v2 = vmul.f32 0.5, %v1954_v1  ;;  %v514_v4 = vmul.f32 0.5, %v1958_v3  ;;  %v513_v7 = vmul.f32 0.5, %v1962_v5  ;;  %v1966_v8 = vld [vmem:[%s1932_s25 + $0x60] sm:$0xff]  ;;  %v1970_v11 = vld [vmem:[%s1932_s25 + $0x58] sm:$0xff]  ;;  %v1974_v14 = vld [vmem:[%s1932_s25 + $0x50] sm:$0xff] }
  0x96   : > { %v512_v10 = vmul.f32 0.5, %v1966_v8  ;;  %v511_v13 = vmul.f32 0.5, %v1970_v11  ;;  %v483_v15 = vld [vmem:[%s1926_s27 + $0x78] sm:$0xff]  ;;  %v482_v17 = vld [vmem:[%s1926_s27 + $0x70] sm:$0xff]  ;;  %v510_v19 = vmul.f32 0.5, %v1974_v14  ;;  %v1984_v22 = vld [vmem:[%s1926_s27 + $0x68] sm:$0xff] }
  0x97   : > { %v546_v6 = vmul.f32 1.442695, %v515_v2  ;;  %v544_v9 = vmul.f32 1.442695, %v514_v4  ;;  %v542_v12 = vmul.f32 1.442695, %v513_v7 }
  0x98   : > { %v540_v18 = vmul.f32 1.442695, %v512_v10  ;;  %v1989_v24 = vld [vmem:[%s1926_s27 + $0x60] sm:$0xff]  ;;  %v538_v25 = vmul.f32 1.442695, %v511_v13  ;;  %v1992_v26 = vld [vmem:[%s1932_s25 + $0x48] sm:$0xff] }
  0x99   : > { %1320 = vpow2.f32 %v546_v6  ;;  %v563_v27 = vld [vmem:[%s1934_s19 + $0x78] sm:$0xff]  ;;  %v536_v30 = vmul.f32 1.442695, %v510_v19  ;;  %v2001_v31 = vld [vmem:[%s1932_s25 + $0x40] sm:$0xff]  ;;  %v562_v33 = vld [vmem:[%s1934_s19 + $0x70] sm:$0xff]  ;;  %v509_v39 = vmul.f32 0.5, %v1992_v26 }
  0x9a   : > { %v1977_v16 = vstv %s620_s3  ;;  %1322 = vpow2.f32 %v544_v9  ;;  %v1998_v29 = vld [vmem:[%s1926_s27 + $0x58] sm:$0xff]  ;;  %v2007_v35 = vld [vmem:[%s1926_s27 + $0x50] sm:$0xff]  ;;  %v561_v43 = vld [vmem:[%s1934_s19 + $0x68] sm:$0xff]  ;;  %v508_v45 = vmul.f32 0.5, %v2001_v31  ;;  %s2070_s20 = sld [smem:[#allocation4 + $0x1]] }
  0x9b   : > { %v643_v20 = vsub.f32 %v483_v15, %v1977_v16  ;;  %v642_v21 = vsub.f32 %v482_v17, %v1977_v16  ;;  %1324 = vpow2.f32 %v542_v12  ;;  %v641_v23 = vsub.f32 %v1984_v22, %v1977_v16  ;;  %v2021_v63 = vld [vmem:[%s1926_s27 + $0x48] sm:$0xff]  ;;  %v2024_v2 = vld [vmem:[%s1932_s25 + $0x38] sm:$0xff]  ;;  %v560_v6 = vld [vmem:[%s1934_s19 + $0x60] sm:$0xff] }
  0x9c   : > { %1326 = vpow2.f32 %v540_v18  ;;  %v640_v28 = vsub.f32 %v1989_v24, %v1977_v16  ;;  %v639_v34 = vsub.f32 %v1998_v29, %v1977_v16  ;;  %v638_v38 = vsub.f32 %v2007_v35, %v1977_v16  ;;  %v2032_v12 = vld [vmem:[%s1932_s25 + $0x30] sm:$0xff] }
  0x9d   : > { %v692_v32 = vmul.f32 %v643_v20, %v643_v20  ;;  %1328 = vpow2.f32 %v538_v25  ;;  %v691_v37 = vmul.f32 %v642_v21, %v642_v21  ;;  %v690_v44 = vmul.f32 %v641_v23, %v641_v23 }
  0x9e   : > { %1330 = vpow2.f32 %v536_v30  ;;  %v689_v49 = vmul.f32 %v640_v28, %v640_v28  ;;  %v534_v50 = vmul.f32 1.442695, %v509_v39  ;;  %v688_v55 = vmul.f32 %v639_v34, %v639_v34 }
  0x9f   : > { %v1321_v36 = vpop.eup %1320  ;;  %v687_v59 = vmul.f32 %v638_v38, %v638_v38  ;;  %v532_v0 = vmul.f32 1.442695, %v508_v45  ;;  %v637_v10 = vsub.f32 %v2021_v63, %v1977_v16  ;;  %v507_v19 = vmul.f32 0.5, %v2024_v2 }
  0xa0   : > { %v1323_v40 = vpop.eup %1322  ;;  %v579_v41 = vmul.f32 %v1321_v36, %v563_v27  ;;  %v676_v42 = vmul.f32 %v1321_v36, %v1321_v36  ;;  %1332 = vpow2.f32 %v534_v50  ;;  %v506_v25 = vmul.f32 0.5, %v2032_v12  ;;  %v559_v27 = vld [vmem:[%s1934_s19 + $0x58] sm:$0xff]  ;;  %s622_s21 = ssub.f32 0.0, %s2070_s20 }
  0xa1   : > { %v1325_v46 = vpop.eup %1324  ;;  %v578_v47 = vmul.f32 %v1323_v40, %v562_v33  ;;  %v675_v48 = vmul.f32 %v1323_v40, %v1323_v40  ;;  %1334 = vpow2.f32 %v532_v0  ;;  %v686_v28 = vmul.f32 %v637_v10, %v637_v10  ;;  %v556_v0 = vld [vmem:[%s1934_s19 + $0x40] sm:$0xff] }
  0xa2   : > { %v1327_v51 = vpop.eup %1326  ;;  %v595_v52 = vadd.f32 %v579_v41, %v483_v15  ;;  %v2014_v53 = vadd.f32 %v692_v32, %v676_v42  ;;  %v674_v54 = vmul.f32 %v1325_v46, %v1325_v46  ;;  %v577_v57 = vmul.f32 %v1325_v46, %v561_v43  ;;  %v476_v15 = vld [vmem:[%s1926_s27 + $0x40] sm:$0xff]  ;;  %v474_v41 = vld [vmem:[%s1926_s27 + $0x30] sm:$0xff] }
  0xa3   : > { %v2016_v56 = vadd.f32 %v691_v37, %v675_v48  ;;  %v673_v58 = vmul.f32 %v1327_v51, %v1327_v51  ;;  %v1329_v60 = vpop.eup %1328  ;;  %v594_v61 = vadd.f32 %v578_v47, %v482_v17  ;;  %v636_v18 = vsub.f32 %v476_v15, %v1977_v16  ;;  %v475_v37 = vld [vmem:[%s1926_s27 + $0x38] sm:$0xff]  ;;  %v558_v42 = vld [vmem:[%s1934_s19 + $0x50] sm:$0xff] }
  0xa4   : > { %598 = vmatpush.xpose.msra.mxu0 %v595_v52  ;;  %v2018_v62 = vadd.f32 %v690_v44, %v674_v54  ;;  %v1331_v4 = vpop.eup %1330  ;;  %v672_v9 = vmul.f32 %v1329_v60, %v1329_v60  ;;  %v593_v20 = vadd.f32 %v577_v57, %v1984_v22  ;;  %v576_v21 = vmul.f32 %v1327_v51, %v560_v6  ;;  %v557_v51 = vld [vmem:[%s1934_s19 + $0x48] sm:$0xff] }
  0xa5   : > { %v2027_v7 = vadd.f32 %v689_v49, %v673_v58  ;;  %v671_v13 = vmul.f32 %v1331_v4, %v1331_v4  ;;  %v530_v30 = vmul.f32 1.442695, %v507_v19  ;;  %v528_v33 = vmul.f32 1.442695, %v506_v25  ;;  %v2056_v49 = vld [vmem:[%s1932_s25 + $0x28] sm:$0xff] }
  0xa6   : > { %v2035_v17 = vadd.f32 %v688_v55, %v672_v9  ;;  %v1333_v32 = vpop.eup %1332  ;;  %v685_v36 = vmul.f32 %v636_v18, %v636_v18  ;;  %v592_v22 = vadd.f32 %v576_v21, %v1989_v24  ;;  %v575_v39 = vmul.f32 %v1329_v60, %v559_v27  ;;  %v555_v18 = vld [vmem:[%s1934_s19 + $0x38] sm:$0xff]  ;;  %v2079_v27 = vld [vmem:[%s1932_s25 + $0x10] sm:$0xff] }
  0xa7   : > { %v2040_v23 = vadd.f32 %v687_v59, %v671_v13  ;;  %v670_v34 = vmul.f32 %v1333_v32, %v1333_v32  ;;  %1336 = vpow2.f32 %v530_v30  ;;  %v1335_v38 = vpop.eup %1334  ;;  %v635_v40 = vsub.f32 %v475_v37, %v1977_v16  ;;  %v2074_v13 = vld [vmem:[%s1932_s25 + $0x18] sm:$0xff] }
  0xa8   : > { %599 = vmatpush.xpose.msra.mxu0 %v594_v61  ;;  %1338 = vpow2.f32 %v528_v33  ;;  %v669_v44 = vmul.f32 %v1335_v38, %v1335_v38  ;;  %v634_v45 = vsub.f32 %v474_v41, %v1977_v16  ;;  %v591_v47 = vadd.f32 %v575_v39, %v1998_v29  ;;  %v2064_v61 = vld [vmem:[%s1932_s25 + $0x20] sm:$0xff] }
  0xa9   : > { %v2049_v43 = vadd.f32 %v686_v28, %v670_v34  ;;  %v574_v24 = vmul.f32 %v1331_v4, %v558_v42  ;;  %v684_v48 = vmul.f32 %v635_v40, %v635_v40  ;;  %v505_v58 = vmul.f32 0.5, %v2056_v49  ;;  %v554_v28 = vld [vmem:[%s1934_s19 + $0x30] sm:$0xff]  ;;  %v2085_v34 = vld [vmem:[%s1932_s25 + $0x8] sm:$0xff] }
  0xaa   : > { %v2052_v46 = vadd.f32 %v685_v36, %v669_v44  ;;  %v683_v52 = vmul.f32 %v634_v45, %v634_v45  ;;  %v573_v60 = vmul.f32 %v1333_v32, %v557_v51  ;;  %v504_v9 = vmul.f32 0.5, %v2064_v61  ;;  %v2093_v44 = vld [vmem:[%s1932_s25] sm:$0xff] }
  0xab   : > { %v590_v59 = vadd.f32 %v574_v24, %v2007_v35  ;;  %v526_v6 = vmul.f32 1.442695, %v505_v58  ;;  %v572_v35 = vmul.f32 %v1335_v38, %v556_v0  ;;  %v623_v39 = vstv %s622_s21  ;;  %v552_v24 = vld [vmem:[%s1934_s19 + $0x20] sm:$0xff] }
  0xac   : > { %600 = vmatpush.xpose.msra.mxu0 %v593_v20  ;;  %v589_v10 = vadd.f32 %v573_v60, %v2021_v63  ;;  %v524_v19 = vmul.f32 1.442695, %v504_v9  ;;  %v503_v20 = vmul.f32 0.5, %v2074_v13  ;;  %v502_v63 = vmul.f32 0.5, %v2079_v27  ;;  %v550_v9 = vld [vmem:[%s1934_s19 + $0x10] sm:$0xff] }
  0xad   : > { %v1337_v50 = vpop.eup %1336  ;;  %1340 = vpow2.f32 %v526_v6  ;;  %v588_v21 = vadd.f32 %v572_v35, %v476_v15  ;;  %v553_v15 = vld [vmem:[%s1934_s19 + $0x28] sm:$0xff]  ;;  %v471_v6 = vld [vmem:[%s1926_s27 + $0x18] sm:$0xff] }
  0xae   : > { %v1339_v54 = vpop.eup %1338  ;;  %v668_v55 = vmul.f32 %v1337_v50, %v1337_v50  ;;  %v571_v25 = vmul.f32 %v1337_v50, %v555_v18  ;;  %1342 = vpow2.f32 %v524_v19  ;;  %v522_v30 = vmul.f32 1.442695, %v503_v20  ;;  %v470_v19 = vld [vmem:[%s1926_s27 + $0x10] sm:$0xff]  ;;  %v549_v20 = vld [vmem:[%s1934_s19 + $0x8] sm:$0xff] }
  0xaf   : > { %v667_v57 = vmul.f32 %v1339_v54, %v1339_v54  ;;  %v570_v33 = vmul.f32 %v1339_v54, %v554_v28  ;;  %v520_v38 = vmul.f32 1.442695, %v502_v63  ;;  %v500_v50 = vmul.f32 0.5, %v2093_v44  ;;  %v472_v54 = vld [vmem:[%s1926_s27 + $0x20] sm:$0xff] }
  0xb0   : > { %601 = vmatpush.xpose.msra.mxu0 %v592_v22  ;;  %v2061_v29 = vadd.f32 %v684_v48, %v668_v55  ;;  %v587_v32 = vadd.f32 %v571_v25, %v475_v37  ;;  %1344 = vpow2.f32 %v522_v30  ;;  %v501_v22 = vmul.f32 0.5, %v2085_v34  ;;  %v551_v55 = vld [vmem:[%s1934_s19 + $0x18] sm:$0xff]  ;;  %v469_v30 = vld [vmem:[%s1926_s27 + $0x8] sm:$0xff]  ;;  %v548_v63 = vld [vmem:[%s1934_s19] sm:$0xff] }
  0xb1   : > { %v2067_v4 = vadd.f32 %v683_v52, %v667_v57  ;;  %v586_v40 = vadd.f32 %v570_v33, %v474_v41  ;;  %v624_v37 = vmul.f32 1.442695, %v623_v39  ;;  %v516_v57 = vmul.f32 1.442695, %v500_v50  ;;  %v597_v50 = vld [vmem:[%s357_s17] sm:$0xff]  ;;  %s2369_s17 = sld [smem:[#allocation24_spill]] }
  0xb2   : > { %v518_v48 = vmul.f32 1.442695, %v501_v22 }
  0xb3   : > { %v2087_v36 = vpop.eup %1340  ;;  %1346 = vpow2.f32 %v624_v37 }
  0xb4   : > { %602 = vmatpush.xpose.msra.mxu0 %v591_v47  ;;  %v569_v42 = vmul.f32 %v2087_v36, %v553_v15  ;;  %v2095_v45 = vpop.eup %1342  ;;  %v473_v47 = vld [vmem:[%s1926_s27 + $0x28] sm:$0xff]  ;;  %1348 = vpow2.f32 %v520_v38  ;;  %v468_v15 = vld [vmem:[%s1926_s27] sm:$0xff]  ;;  %v2111_v38 = vstv %s2070_s20 }
  0xb5   : > { %v568_v41 = vmul.f32 %v2095_v45, %v552_v24  ;;  %1350 = vpow2.f32 %v518_v48  ;;  %v647_v39 = vsub.f32 %v2111_v38, %v2079_v27  ;;  %v650_v37 = vsub.f32 %v2111_v38, %v2056_v49 }
  0xb6   : > { %v585_v51 = vadd.f32 %v569_v42, %v473_v47  ;;  %v1345_v52 = vpop.eup %1344  ;;  %1352 = vpow2.f32 %v516_v57  ;;  %v649_v42 = vsub.f32 %v2111_v38, %v2064_v61  ;;  %v651_v24 = vsub.f32 %v2111_v38, %v2032_v12 }
  0xb7   : > { %v567_v60 = vmul.f32 %v1345_v52, %v551_v55  ;;  %v652_v48 = vsub.f32 %v2111_v38, %v2024_v2  ;;  %v630_v55 = vsub.f32 %v470_v19, %v1977_v16  ;;  %v629_v57 = vsub.f32 %v469_v30, %v1977_v16  ;;  %p1154_p5 = scmp.ne.s32.totalorder %s2369_s17, 1 }
  0xb8   : > { %603 = vmatpush.xpose.msra.mxu0 %v590_v59  ;;  %v584_v59 = vadd.f32 %v568_v41, %v472_v54  ;;  %v631_v41 = vsub.f32 %v471_v6, %v1977_v16 }
  0xb9   : > { %v1347_v58 = vpop.eup %1346 }
  0xba   : > { %v1349_v0 = vpop.eup %1348  ;;  %1162 = vpush %v1347_v58  ;;  %v628_v58 = vsub.f32 %v468_v15, %v1977_v16 }
  0xbb   : > { %v566_v35 = vmul.f32 %v1349_v0, %v550_v9  ;;  %v1351_v18 = vpop.eup %1350 }
  0xbc   : > { %604 = vmatpush.xpose.msra.mxu0 %v589_v10  ;;  %v583_v10 = vadd.f32 %v567_v60, %v471_v6  ;;  %v565_v25 = vmul.f32 %v1351_v18, %v549_v20  ;;  %v1353_v28 = vpop.eup %1352  ;;  %v666_v60 = vmul.f32 %v2087_v36, %v2087_v36  ;;  %v663_v20 = vmul.f32 %v1349_v0, %v1349_v0 }
  0xbd   : > { %v564_v33 = vmul.f32 %v1353_v28, %v548_v63  ;;  %v661_v63 = vmul.f32 %v1353_v28, %v1353_v28  ;;  %v677_v6 = vmul.f32 %v628_v58, %v628_v58  ;;  %v645_v36 = vsub.f32 %v2111_v38, %v2093_v44 }
  0xbe   : > { %v653_v0 = vsub.f32 %v2111_v38, %v2001_v31  ;;  %v656_v28 = vsub.f32 %v2111_v38, %v1970_v11  ;;  %v658_v44 = vsub.f32 %v2111_v38, %v1962_v5  ;;  %v660_v31 = vsub.f32 %v2111_v38, %v1954_v1 }
  0xbf   : > { %v580_v22 = vadd.f32 %v564_v33, %v468_v15 }
  0xc0   : > { %605 = vmatpush.xpose.msra.mxu0 %v588_v21  ;;  %v582_v21 = vadd.f32 %v566_v35, %v470_v19  ;;  %v680_v35 = vmul.f32 %v631_v41, %v631_v41  ;;  %v665_v19 = vmul.f32 %v2095_v45, %v2095_v45  ;;  %v654_v45 = vsub.f32 %v2111_v38, %v1992_v26 }
  0xc4   : > { %606 = vmatpush.xpose.msra.mxu0 %v587_v32  ;;  %v581_v32 = vadd.f32 %v565_v25, %v469_v30  ;;  %v662_v25 = vmul.f32 %v1351_v18, %v1351_v18  ;;  %v655_v18 = vsub.f32 %v2111_v38, %v1974_v14 }
  0xc8   : > { %607 = vmatpush.xpose.msra.mxu0 %v586_v40  ;;  %v648_v40 = vsub.f32 %v2111_v38, %v2074_v13 }
  0xcc   : > { %608 = vmatpush.xpose.msra.mxu0 %v585_v51  ;;  %v633_v51 = vsub.f32 %v473_v47, %v1977_v16  ;;  %v678_v47 = vmul.f32 %v629_v57, %v629_v57 }
  0xce   : > { %v682_v9 = vmul.f32 %v633_v51, %v633_v51 }
  0xd0   : > { %609 = vmatpush.xpose.msra.mxu0 %v584_v59  ;;  %v632_v59 = vsub.f32 %v472_v54, %v1977_v16  ;;  %v694_v16 = vadd.f32 %v678_v47, %v662_v25  ;;  %v693_v54 = vadd.f32 %v677_v6, %v661_v63 }
  0xd2   : > { %v681_v30 = vmul.f32 %v632_v59, %v632_v59 }
  0xd4   : > { %610 = vmatpush.xpose.msra.mxu0 %v583_v10  ;;  %v664_v10 = vmul.f32 %v1345_v52, %v1345_v52  ;;  %v646_v52 = vsub.f32 %v2111_v38, %v2085_v34  ;;  %v659_v34 = vsub.f32 %v2111_v38, %v1958_v3 }
  0xd6   : > { %v696_v33 = vadd.f32 %v680_v35, %v664_v10 }
  0xd8   : > { %611 = vmatpush.xpose.msra.mxu0 %v582_v21  ;;  %v679_v21 = vmul.f32 %v630_v55, %v630_v55 }
  0xda   : > { %v695_v15 = vadd.f32 %v679_v21, %v663_v20 }
  0xdc   : > { %612 = vmatpush.xpose.msra.mxu0 %v581_v32  ;;  %v698_v32 = vadd.f32 %v682_v9, %v666_v60 }
  0xe0   : > { %613 = vmatpush.xpose.msra.mxu0 %v580_v22  ;;  %v697_v22 = vadd.f32 %v681_v30, %v665_v19  ;;  %v775_v19 = vld [vmem:[#allocation3] sm:$0xff]  ;;  %v776_v30 = vld [vmem:[#allocation3 + $0x58] sm:$0xff] }
  0xe3   : > { %614 = vmatmul.f32.vlgmr.msra.gmra.mxu0 %v597_v50  ;;  %v657_v50 = vsub.f32 %v2111_v38, %v1966_v8 }
  0xeb   : > { %s1163_s18 = spop %1162 }
  0xec   : > { %v709_v51 = vstv %s1163_s18 }
  0xed   : > { %v710_v26 = vmul.f32 %v709_v51, %v693_v54  ;;  %v711_v41 = vmul.f32 %v709_v51, %v694_v16  ;;  %v712_v55 = vmul.f32 %v709_v51, %v695_v15  ;;  %v713_v14 = vmul.f32 %v709_v51, %v696_v33  ;;  %v777_v15 = vld [vmem:[#allocation3 + $0x18] sm:$0xff] }
  0xee   : > { %v714_v57 = vmul.f32 %v709_v51, %v697_v22  ;;  %v715_v58 = vmul.f32 %v709_v51, %v698_v32  ;;  %v716_v11 = vmul.f32 %v709_v51, %v2067_v4  ;;  %v717_v8 = vmul.f32 %v709_v51, %v2061_v29 }
  0xef   : > { %v718_v59 = vmul.f32 %v709_v51, %v2052_v46  ;;  %v719_v5 = vmul.f32 %v709_v51, %v2049_v43  ;;  %v720_v3 = vmul.f32 %v709_v51, %v2040_v23  ;;  %v721_v60 = vmul.f32 %v709_v51, %v2035_v17 }
  0xf0   : > { %v722_v1 = vmul.f32 %v709_v51, %v2027_v7  ;;  %v723_v9 = vmul.f32 %v709_v51, %v2018_v62  ;;  %v724_v10 = vmul.f32 %v709_v51, %v2016_v56  ;;  %v725_v35 = vmul.f32 %v709_v51, %v2014_v53 }
  0xf1   : > { %v726_v20 = vadd.f32 %v710_v26, %v645_v36  ;;  %v727_v4 = vadd.f32 %v711_v41, %v646_v52  ;;  %v728_v46 = vadd.f32 %v712_v55, %v647_v39  ;;  %v729_v23 = vadd.f32 %v713_v14, %v648_v40  ;;  %v778_v36 = vld [vmem:[#allocation3 + $0x50] sm:$0xff]  ;;  %v781_v41 = vld [vmem:[#allocation3 + $0x48] sm:$0xff] }
  0xf2   : > { %v730_v7 = vadd.f32 %v714_v57, %v649_v42  ;;  %v731_v56 = vadd.f32 %v715_v58, %v650_v37  ;;  %v732_v53 = vadd.f32 %v716_v11, %v651_v24  ;;  %v733_v62 = vadd.f32 %v717_v8, %v652_v48  ;;  %v774_v48 = vld [vmem:[#allocation3 + $0x30] sm:$0xff]  ;;  %v782_v58 = vld [vmem:[#allocation3 + $0x40] sm:$0xff] }
  0xf3   : > { %v734_v17 = vadd.f32 %v718_v59, %v653_v0  ;;  %v735_v43 = vadd.f32 %v719_v5, %v654_v45  ;;  %v736_v29 = vadd.f32 %v720_v3, %v655_v18  ;;  %v737_v13 = vadd.f32 %v721_v60, %v656_v28  ;;  %v779_v0 = vld [vmem:[#allocation3 + $0x68] sm:$0xff]  ;;  %v783_v5 = vld [vmem:[#allocation3 + $0x20] sm:$0xff] }
  0xf4   : > { %v738_v27 = vadd.f32 %v722_v1, %v657_v50  ;;  %v739_v39 = vadd.f32 %v723_v9, %v658_v44  ;;  %v740_v61 = vadd.f32 %v724_v10, %v659_v34  ;;  %v741_v40 = vadd.f32 %v725_v35, %v660_v31  ;;  %v780_v34 = vld [vmem:[#allocation3 + $0x8] sm:$0xff]  ;;  %v784_v9 = vld [vmem:[#allocation3 + $0x10] sm:$0xff] }
  0xf5   : > { %v1138_v42 = vadd.f32 -1.0, %v726_v20  ;;  %v1139_v21 = vadd.f32 -1.0, %v727_v4  ;;  %v1140_v49 = vadd.f32 -1.0, %v728_v46  ;;  %v1141_v37 = vadd.f32 -1.0, %v729_v23  ;;  %v785_v20 = vld [vmem:[#allocation3 + $0x38] sm:$0xff]  ;;  %v786_v23 = vld [vmem:[#allocation3 + $0x60] sm:$0xff] }
  0xf6   : > { %v1142_v25 = vadd.f32 -1.0, %v730_v7  ;;  %v1143_v47 = vadd.f32 -1.0, %v731_v56  ;;  %v1144_v12 = vadd.f32 -1.0, %v732_v53  ;;  %v1145_v2 = vadd.f32 -1.0, %v733_v62  ;;  %v787_v53 = vld [vmem:[#allocation3 + $0x70] sm:$0xff] }
  0xf7   : > { %v758_v24 = vmul.f32 0.5, %v1138_v42  ;;  %v759_v63 = vmul.f32 0.5, %v1139_v21  ;;  %v760_v6 = vmul.f32 0.5, %v1140_v49  ;;  %v761_v38 = vmul.f32 0.5, %v1141_v37  ;;  %v596_v42 = vld [vmem:[#allocation2] sm:$0xff] }
  0xf8   : > { %v1146_v32 = vadd.f32 -1.0, %v734_v17  ;;  %v762_v33 = vmul.f32 0.5, %v1142_v25  ;;  %v1147_v16 = vadd.f32 -1.0, %v735_v43  ;;  %v1148_v54 = vadd.f32 -1.0, %v736_v29  ;;  %v788_v43 = vld [vmem:[#allocation3 + $0x78] sm:$0xff] }
  0xf9   : > { %v763_v22 = vmul.f32 0.5, %v1143_v47  ;;  %v764_v52 = vmul.f32 0.5, %v1144_v12  ;;  %v790_v45 = vadd.f32 %v774_v48, %v758_v24  ;;  %v791_v18 = vadd.f32 %v775_v19, %v759_v63 }
  0xfa   : > { %v792_v28 = vadd.f32 %v776_v30, %v760_v6  ;;  %v1149_v50 = vadd.f32 -1.0, %v737_v13  ;;  %v765_v44 = vmul.f32 0.5, %v1145_v2  ;;  %v793_v31 = vadd.f32 %v777_v15, %v761_v38  ;;  %v789_v13 = vld [vmem:[#allocation3 + $0x28] sm:$0xff] }
  0xfb   : > { %v1150_v51 = vadd.f32 -1.0, %v738_v27  ;;  %v766_v26 = vmul.f32 0.5, %v1146_v32  ;;  %v794_v55 = vadd.f32 %v778_v36, %v762_v33  ;;  %806 = vst [vmem:[#allocation3 + $0x30] sm:$0xff] %v790_v45  ;;  %v1151_v14 = vadd.f32 -1.0, %v739_v39 }
  0xfc   : > { %v767_v57 = vmul.f32 0.5, %v1147_v16  ;;  %v795_v11 = vadd.f32 %v779_v0, %v763_v22  ;;  %807 = vst [vmem:[#allocation3] sm:$0xff] %v791_v18  ;;  %v1152_v8 = vadd.f32 -1.0, %v740_v61  ;;  %v768_v59 = vmul.f32 0.5, %v1148_v54 }
  0xfd   : > { %v796_v3 = vadd.f32 %v780_v34, %v764_v52  ;;  %808 = vst [vmem:[#allocation3 + $0x58] sm:$0xff] %v792_v28  ;;  %v1153_v60 = vadd.f32 -1.0, %v741_v40  ;;  %v769_v1 = vmul.f32 0.5, %v1149_v50  ;;  %v797_v10 = vadd.f32 %v781_v41, %v765_v44 }
  0xfe   : > { %809 = vst [vmem:[#allocation3 + $0x18] sm:$0xff] %v793_v31  ;;  %v770_v35 = vmul.f32 0.5, %v1150_v51  ;;  %v798_v4 = vadd.f32 %v782_v58, %v766_v26  ;;  %v771_v46 = vmul.f32 0.5, %v1151_v14  ;;  %v799_v7 = vadd.f32 %v783_v5, %v767_v57 }
  0xff   : > { %810 = vst [vmem:[#allocation3 + $0x50] sm:$0xff] %v794_v55  ;;  %v772_v56 = vmul.f32 0.5, %v1152_v8  ;;  %v800_v62 = vadd.f32 %v784_v9, %v768_v59  ;;  %v773_v17 = vmul.f32 0.5, %v1153_v60  ;;  %v801_v29 = vadd.f32 %v785_v20, %v769_v1 }
 0x100   : > { %811 = vst [vmem:[#allocation3 + $0x68] sm:$0xff] %v795_v11  ;;  %v802_v27 = vadd.f32 %v786_v23, %v770_v35  ;;  %v803_v39 = vadd.f32 %v787_v53, %v771_v46 }
 0x101   : > { %812 = vst [vmem:[#allocation3 + $0x8] sm:$0xff] %v796_v3  ;;  %v804_v61 = vadd.f32 %v788_v43, %v772_v56  ;;  %v805_v40 = vadd.f32 %v789_v13, %v773_v17 }
 0x102   : > { %813 = vst [vmem:[#allocation3 + $0x48] sm:$0xff] %v797_v10 }
 0x103   : > { %814 = vst [vmem:[#allocation3 + $0x40] sm:$0xff] %v798_v4 }
 0x104   : > { %815 = vst [vmem:[#allocation3 + $0x20] sm:$0xff] %v799_v7 }
 0x105   : > { %816 = vst [vmem:[#allocation3 + $0x10] sm:$0xff] %v800_v62 }
 0x106   : > { %817 = vst [vmem:[#allocation3 + $0x38] sm:$0xff] %v801_v29 }
 0x107   : > { %818 = vst [vmem:[#allocation3 + $0x60] sm:$0xff] %v802_v27 }
 0x108   : > { %819 = vst [vmem:[#allocation3 + $0x70] sm:$0xff] %v803_v39 }
 0x109   : > { %820 = vst [vmem:[#allocation3 + $0x78] sm:$0xff] %v804_v61 }
 0x10a   : > { %821 = vst [vmem:[#allocation3 + $0x28] sm:$0xff] %v805_v40 }
 0x15f   : > { %825 = sbr.rel (%p1154_p5) target bundleno = 514 (0x202), region = 68 }
 0x160   : > { %v615_v21 = vpop.f32.mrf.mxu0 }
 0x161   : > { %v618_v49 = vadd.f32 %v615_v21, %v596_v42 }
 0x163   : > { %619 = vst [vmem:[#allocation2] sm:$0xff] %v618_v49 }
 0x164   : > { %v828_v37 = vld [vmem:[#allocation3 + $0x30] sm:$0xff]  ;;  %v830_v47 = vld [vmem:[#allocation3 + $0x58] sm:$0xff]  ;;  %v829_v12 = vld [vmem:[#allocation3] sm:$0xff]  ;;  %vm876_vm0 = vcmask 7168  }
 0x165   : > { %v832_v25 = vld [vmem:[#allocation3 + $0x50] sm:$0xff]  ;;  %844 = vadd.xlane.f32.xlu0 %v828_v37  ;;  %848 = vadd.xlane.f32.xlu1 %v830_v47  ;;  %v833_v24 = vld [vmem:[#allocation3 + $0x68] sm:$0xff]  ;;  %v831_v63 = vld [vmem:[#allocation3 + $0x18] sm:$0xff] }
 0x166   : > { %852 = vadd.xlane.f32.xlu2 %v832_v25  ;;  %v834_v6 = vld [vmem:[#allocation3 + $0x8] sm:$0xff]  ;;  %v836_v2 = vld [vmem:[#allocation3 + $0x40] sm:$0xff]  ;;  %v839_v19 = vld [vmem:[#allocation3 + $0x38] sm:$0xff] }
 0x167   : > { %v835_v38 = vld [vmem:[#allocation3 + $0x48] sm:$0xff]  ;;  %v837_v48 = vld [vmem:[#allocation3 + $0x20] sm:$0xff]  ;;  %v838_v30 = vld [vmem:[#allocation3 + $0x10] sm:$0xff] }
 0x168   : > { %v840_v32 = vld [vmem:[#allocation3 + $0x60] sm:$0xff]  ;;  %v842_v33 = vld [vmem:[#allocation3 + $0x78] sm:$0xff]  ;;  %v841_v15 = vld [vmem:[#allocation3 + $0x70] sm:$0xff] }
 0x169   : > { %v843_v16 = vld [vmem:[#allocation3 + $0x28] sm:$0xff] }
 0x16a   : > { %v826_v18 = vld [vmem:[#allocation2] sm:$0xff] }
 0x16b   : > { %827 = vst [vmem:[%s430_s16] sm:$0xff] %v826_v18 }
 0x16d   : > { %846 = vadd.xlane.f32.xlu0 %v829_v12  ;;  %850 = vadd.xlane.f32.xlu1 %v831_v63 }
 0x16e   : > { %854 = vadd.xlane.f32.xlu2 %v833_v24 }
 0x175   : > { %856 = vadd.xlane.f32.xlu0 %v834_v6  ;;  %858 = vadd.xlane.f32.xlu1 %v835_v38 }
 0x176   : > { %860 = vadd.xlane.f32.xlu2 %v836_v2 }
 0x17d   : > { %862 = vadd.xlane.f32.xlu0 %v837_v48  ;;  %864 = vadd.xlane.f32.xlu1 %v838_v30 }
 0x17e   : > { %866 = vadd.xlane.f32.xlu2 %v839_v19 }
 0x185   : > { %868 = vadd.xlane.f32.xlu0 %v840_v32  ;;  %870 = vadd.xlane.f32.xlu1 %v841_v15 }
 0x186   : > { %872 = vadd.xlane.f32.xlu2 %v842_v33 }
 0x18d   : > { %874 = vadd.xlane.f32.xlu0 %v843_v16 }
 0x1d8   : > { %v845_v54 = vpop.xlane.xlu0 %844  ;;  %v849_v36 = vpop.xlane.xlu1 %848 }
 0x1d9   : > { %v853_v22 = vpop.xlane.xlu2 %852  ;;  %877 = vst.msk [vmem:[%s1949_s15] sm:$0xff] %vm876_vm0, %v845_v54 }
 0x1da   : > { %881 = vst.msk [vmem:[%s1949_s15 + $0x20] sm:$0xff] %vm876_vm0, %v853_v22 }
 0x1db   : > { %879 = vst.msk [vmem:[%s1949_s15 + $0x10] sm:$0xff] %vm876_vm0, %v849_v36 }
 0x1e0   : > { %v847_v52 = vpop.xlane.xlu0 %846  ;;  %v851_v45 = vpop.xlane.xlu1 %850 }
 0x1e1   : > { %v855_v0 = vpop.xlane.xlu2 %854  ;;  %878 = vst.msk [vmem:[%s1949_s15 + $0x8] sm:$0xff] %vm876_vm0, %v847_v52 }
 0x1e2   : > { %882 = vst.msk [vmem:[%s1949_s15 + $0x28] sm:$0xff] %vm876_vm0, %v855_v0 }
 0x1e3   : > { %880 = vst.msk [vmem:[%s1949_s15 + $0x18] sm:$0xff] %vm876_vm0, %v851_v45 }
 0x1e8   : > { %v857_v28 = vpop.xlane.xlu0 %856  ;;  %v859_v44 = vpop.xlane.xlu1 %858 }
 0x1e9   : > { %v861_v50 = vpop.xlane.xlu2 %860  ;;  %883 = vst.msk [vmem:[%s1949_s15 + $0x30] sm:$0xff] %vm876_vm0, %v857_v28 }
 0x1ea   : > { %885 = vst.msk [vmem:[%s1949_s15 + $0x40] sm:$0xff] %vm876_vm0, %v861_v50 }
 0x1eb   : > { %884 = vst.msk [vmem:[%s1949_s15 + $0x38] sm:$0xff] %vm876_vm0, %v859_v44 }
 0x1f0   : > { %v863_v34 = vpop.xlane.xlu0 %862  ;;  %v865_v51 = vpop.xlane.xlu1 %864 }
 0x1f1   : > { %v867_v31 = vpop.xlane.xlu2 %866  ;;  %886 = vst.msk [vmem:[%s1949_s15 + $0x48] sm:$0xff] %vm876_vm0, %v863_v34 }
 0x1f2   : > { %888 = vst.msk [vmem:[%s1949_s15 + $0x58] sm:$0xff] %vm876_vm0, %v867_v31 }
 0x1f3   : > { %887 = vst.msk [vmem:[%s1949_s15 + $0x50] sm:$0xff] %vm876_vm0, %v865_v51 }
 0x1f8   : > { %v869_v26 = vpop.xlane.xlu0 %868  ;;  %v871_v55 = vpop.xlane.xlu1 %870 }
 0x1f9   : > { %v873_v41 = vpop.xlane.xlu2 %872  ;;  %889 = vst.msk [vmem:[%s1949_s15 + $0x60] sm:$0xff] %vm876_vm0, %v869_v26 }
 0x1fa   : > { %891 = vst.msk [vmem:[%s1949_s15 + $0x70] sm:$0xff] %vm876_vm0, %v873_v41 }
 0x1fb   : > { %890 = vst.msk [vmem:[%s1949_s15 + $0x68] sm:$0xff] %vm876_vm0, %v871_v55 }
 0x200   : > { %v875_v14 = vpop.xlane.xlu0 %874 }
 0x201   : > { %892 = vst.msk [vmem:[%s1949_s15 + $0x78] sm:$0xff] %vm876_vm0, %v875_v14 }
 0x202 PF: > { %s2370_s2 = sld [smem:[#allocation25_spill]]  ;;  %s911_s6 = sshll.u32 %s430_s16, 4  ;;  %s912_s6 = int_to_ptr.vmem [resolvable:$true] %s911_s6 }
 0x203   : > { %s2373_s14 = sld [smem:[#allocation38_spill]]  ;;  %s894_s11 = scalar_lea.sflag [#allocation6], %s428_s0 }
 0x208   : > { %s1156_s25 = sshll.u32 %s2370_s2, 3 }
 0x209   : > { %s909_s24 = scalar_lea.hbm %s2373_s14, %s1156_s25  ;;  %s1509_s3 = scalar_lea.hbm %s2373_s14, 16 }
 0x20a   : > { %s913_s12 = sshll.u32 %s909_s24, 4  ;;  %s914_s12 = int_to_ptr.hbm [resolvable:$true] %s913_s12 }
 0x20b   : > { %s1503_s8 = sshra.s32 %s914_s12, 4  ;;  %s1504_s8 = int_to_ptr.hbm [resolvable:$true] %s1503_s8 }
 0x20c   : > { %s1505_s9 = scalar_lea.hbm %s1504_s8, 8  ;;  %p1510_p7 = scmp.lt.s32.totalorder %s1504_s8, %s2373_s14 }
 0x20d   : > { %p1506_p9 = scmp.ne.s32.totalorder %s1504_s8, %s1505_s9  ;;  %p1511_p8 = scmp.lt.s32.totalorder %s1509_s3, %s1505_s9 }
 0x20f   : > { %p1507_p6 = pnand %p1506_p9, %p1815_p11  ;;  %p1512_p0 = por %p1511_p8, %p1510_p7 }
 0x211   : > { %p1508_p1 = pneg %p1507_p6 }
 0x213   : > { %p1513_p10 = pnand %p1512_p0, %p1508_p1 }
 0x215   : > { %1516 = shalt.err (!%p1513_p10)
}
 0x216   : > { %1176 = dma.vmem_to_hbm [thread:$0]  (%p1815_p11), %s912_s6, 128, %s914_s12, %s894_s11  }
 0x217 PF: > { %s2374_s0 = sld [smem:[#allocation20_spill]]  ;;  %p1202_p12 = scmp.ge.s32.totalorder %s1647_s10, 2 }
 0x219   : > { %p1196_p13 = pnand %p1202_p12, %p1821_p3 }
 0x21b   : > { %p1197_p2 = pneg %p1196_p13 }
 0x21d   : > { %s929_s16 = sand.u32 1, %s2374_s0  }
 0x21e   : > { %s930_s18 = scalar_lea.sflag [#allocation6], %s929_s16 }
 0x21f   : > { %1590 = dma.done.wait (%p1197_p2), %s930_s18, 128  }
 0x220   : > { %1592 = vsyncadd (%p1197_p2), %s930_s18, 4294967168  ;;  %s30_s10 = sadd.s32 1, %s1647_s10   ;;  %s2377_s21 = sld [smem:[#allocation21_spill]] }
 0x221   : > { %p2243_p4 = scmp.ge.s32.totalorder %s30_s10, 6   ;;  %s2378_s24 = sld [smem:[#allocation22_spill]] }
 0x222   : > { %s2379_s27 = sld [smem:[#allocation23_spill]]  ;;  %s2384_s22 = smov %s1603_s23 }
 0x223   : > { %s2380_s2 = sld [smem:[#allocation26_spill]]  ;;  %s2385_s23 = smov %s1872_s7 }
 0x224   : > { %s2381_s5 = sld [smem:[#allocation27_spill]]  ;;  %s2386_s25 = smov %s1615_s26 }
 0x225   : > { %s2382_s8 = sld [smem:[#allocation31_spill]]  ;;  %s2387_s26 = smov %s1877_s30 }
 0x226   : > { %s2383_s9 = sld [smem:[#allocation33_spill]]  ;;  %s2388_s28 = smov %s1627_s29 }
 0x227   : > { %s2389_s29 = smov %s1865_s13  ;;  %29 = sbr.rel (!%p2243_p4) target bundleno = 22 (0x16), region = 147 }
 0x229   : > { %s2390_s30 = smov %s2380_s2 }
 0x22a   : > { %s2391_s7 = smov %s2381_s5 }
 0x22c   :  { %944 = vsyncpa [#allocation5], 1 }
 0x22d   :  { %946 = vsyncpa [#allocation5 + $0x1], 1 }
 0x22e   :  { %947 = vsyncpa [#allocation10], 1 }
 0x22f   :  { %949 = vsyncpa [#allocation10 + $0x1], 1 }
 0x230   :  { %950 = vsyncpa [#allocation13], 1 }
 0x231   :  { %952 = vsyncpa [#allocation13 + $0x1], 1 }
 0x232   :  { %953 = vsyncpa [#allocation6], 1 }
 0x233   :  { %955 = vsyncpa [#allocation6 + $0x1], 1 }
 0x234   :  { %956 = vsyncpa [#allocation7], 1 }
 0x235   :  { %958 = vsyncpa [#allocation7 + $0x1], 1 }

</bundles_post_ra>
